<compile_context>
chip_gen: v6e
topology: v6e:2x2x1
jax: 0.10.0
libtpu: 0.0.40
codegen_flags: <defaults>
</compile_context>

<pallas_src>
import jax
import jax.numpy as jnp
from jax import lax
from jax.experimental import pallas as pl
from jax.experimental.pallas import tpu as pltpu


def _round_up(v, m):
    return -(-v // m) * m


# ---------------------------------------------------------------------------
# Kernels
# ---------------------------------------------------------------------------
def _cls_kernel_transposed(x_ref, w_ref, b_ref, o_ref):
    """logits^T = W @ x^T + b -> [n_class, TB]; lane (fast) axis = batch tile.

    Lane-dense exp / mul / store when n_class << 128.  Contraction is the NT
    form (axis 1 of both operands), so the streaming x tile is fed to the MXU
    without a per-step transpose.
    """
    logits_t = lax.dot_general(
        w_ref[...],                       # [n_class, in_size] (PyTorch layout)
        x_ref[...],                       # [TB, in_size]      (bf16 stream)
        dimension_numbers=(((1,), (1,)), ((), ())),
        preferred_element_type=jnp.float32,
    ) + b_ref[...]                        # [n_class, 1] broadcast over lanes

    # Softmax over the class axis (axis 0 here == PyTorch Softmax(dim=1) on
    # the untransposed [B, n_class] view).  Numerically stable, f32.
    m = jnp.max(logits_t, axis=0, keepdims=True)
    e = jnp.exp(logits_t - m)
    denom = jnp.sum(e, axis=0, keepdims=True)
    # Exact divide: an approx EUP reciprocal applies a common-mode error to a
    # whole row's probabilities and breaks sum(probs) == 1.  denom is tiny
    # ([1, TB]), so the exact divide costs nothing measurable here.
    o_ref[...] = (e / denom).astype(o_ref.dtype)


def _cls_kernel_plain(x_ref, w_ref, b_ref, o_ref):
    """logits = x @ W^T + b -> [TB, n_class]; used when n_class >= 128 (the
    class axis is already lane-dense, no wrapper-side transpose needed)."""
    logits = lax.dot_general(
        x_ref[...],                       # [TB, in_size]
        w_ref[...],                       # [n_class, in_size]
        dimension_numbers=(((1,), (1,)), ((), ())),
        preferred_element_type=jnp.float32,
    ) + b_ref[...]                        # [1, n_class]

    m = jnp.max(logits, axis=1, keepdims=True)
    e = jnp.exp(logits - m)
    o_ref[...] = (e / jnp.sum(e, axis=1, keepdims=True)).astype(o_ref.dtype)


# ---------------------------------------------------------------------------
# Tiling / VMEM budgeting
# ---------------------------------------------------------------------------
def _tile_vmem_bytes(tb, in_size, n_class, x_isz, w_isz):
    """Padded per-stage VMEM footprint: x and f32 output double-buffered,
    weight / bias resident with a single buffer."""
    x_b = 2 * _round_up(tb, 8) * _round_up(in_size, 128) * x_isz
    w_b = 1 * _round_up(n_class, 8) * _round_up(in_size, 128) * w_isz
    b_b = 1 * _round_up(n_class, 8) * 128 * 4
    o_b = 2 * 4 * max(_round_up(n_class, 8) * _round_up(tb, 128),
                      _round_up(tb, 8) * _round_up(n_class, 128))
    return x_b + w_b + b_b + o_b


def _pick_tile(B, in_size, n_class, x_isz, w_isz, tb_max, vmem_cap):
    """Batch tile size.  B <= 256: single block.  B > 256: at least 2 tiles,
    each a multiple of 128 (engages the 2nd TensorCore on v7x and gives the
    pipeline overlap), shrunk until the footprint fits `vmem_cap`."""
    if B <= 256:
        return B
    tb = min(_round_up(tb_max, 128), _round_up(-(-B // 2), 128))
    while tb > 128 and _tile_vmem_bytes(tb, in_size, n_class, x_isz, w_isz) > vmem_cap:
        tb = max(128, _round_up(tb // 2, 128))
    return tb


# ---------------------------------------------------------------------------
# Forward wrapper
# ---------------------------------------------------------------------------
def cls_forward(x, weight, bias, *, compute_dtype=jnp.bfloat16, tb_max=1024,
                vmem_cap_bytes=48 * 1024 * 1024):
    """softmax(x @ weight.T + bias, axis=1) as a Pallas TPU kernel.

    x: [B, in_size]; weight: [n_class, in_size] (PyTorch layout); bias: [n_class].
    Returns float32 [B, n_class].
    """
    B, in_size = x.shape
    n_class, in_size_w = weight.shape
    assert in_size_w == in_size and bias.shape == (n_class,)

    # Feed the MXU narrow (bf16) inputs: the kernel is HBM-bound on the x
    # stream, so halving its bytes ~halves wall clock; accumulation stays f32.
    x_c = x.astype(compute_dtype)
    w_c = weight.astype(compute_dtype)
    b_f32 = bias.astype(jnp.float32)

    tb = _pick_tile(B, in_size, n_class, x_c.dtype.itemsize,
                    w_c.dtype.itemsize, tb_max, vmem_cap_bytes)
    grid = (pl.cdiv(B, tb),)

    # vmem limit derived from the actual padded tiles (+ headroom), not a
    # hard-coded constant; stays v7x-safe via the tile picker's cap.
    vmem_limit = _tile_vmem_bytes(tb, in_size, n_class, x_c.dtype.itemsize,
                                  w_c.dtype.itemsize) + 4 * 1024 * 1024
    vmem_limit = int(min(max(vmem_limit, 8 * 1024 * 1024), 100 * 1024 * 1024))

    compiler_params = pltpu.CompilerParams(
        dimension_semantics=("parallel",),   # batch tiles are independent
        vmem_limit_bytes=vmem_limit,
    )

    if n_class < 128:
        # Transposed, lane-dense layout; output written as [n_class, B].
        kernel = _cls_kernel_transposed
        out_dims = (n_class, B)
        out_block, out_map = (n_class, tb), (lambda i: (0, i))
        b_arg, b_block = b_f32.reshape(n_class, 1), (n_class, 1)
        transpose_result = True
    else:
        # Class axis already lane-dense: compute [TB, n_class] directly.
        kernel = _cls_kernel_plain
        out_dims = (B, n_class)
        out_block, out_map = (tb, n_class), (lambda i: (i, 0))
        b_arg, b_block = b_f32.reshape(1, n_class), (1, n_class)
        transpose_result = False

    def _build_and_call(single_buffer_resident):
        # Grid-invariant weight / bias only need ONE VMEM buffer (their
        # index_map is constant); don't pay double-buffering for them.
        kw = dict(pipeline_mode=pl.Buffered(1)) if single_buffer_resident else {}
        w_spec = pl.BlockSpec((n_class, in_size), lambda i: (0, 0), **kw)
        b_spec = pl.BlockSpec(b_block, lambda i: (0, 0), **kw)
        x_spec = pl.BlockSpec((tb, in_size), lambda i: (i, 0))
        return pl.pallas_call(
            kernel,
            out_shape=jax.ShapeDtypeStruct(out_dims, jnp.float32),
            grid_spec=pltpu.PrefetchScalarGridSpec(
                num_scalar_prefetch=0,
                grid=grid,
                in_specs=[x_spec, w_spec, b_spec],
                out_specs=pl.BlockSpec(out_block, out_map),
            ),
            compiler_params=compiler_params,
        )(x_c, w_c, b_arg)

    try:
        out = _build_and_call(True)
    except Exception:
        # Fallback for toolchains without BlockSpec pipeline_mode / Buffered(1)
        # support; identical math, just default double-buffered residents.
        out = _build_and_call(False)

    # Transposed path: tiny [n_class, B] -> [B, n_class] transpose (only
    # n_class*B*4 bytes) to match the module's output layout.
    return out.T if transpose_result else out


# ---------------------------------------------------------------------------
# Self-test
# ---------------------------------------------------------------------------
if __name__ == "__main__":
    key = jax.random.PRNGKey(0)
    kx, kw, kb, kx2, kx3, kw3, kb3 = jax.random.split(key, 7)

    def ref_softmax(xv, wv, bv):
        # Same contract as the kernel: bf16-rounded inputs, f32 accumulation.
        xb = xv.astype(jnp.bfloat16).astype(jnp.float32)
        wb = wv.astype(jnp.bfloat16).astype(jnp.float32)
        return jax.nn.softmax(xb @ wb.T + bv, axis=1)

    # ---- Small shapes consistent with CLS(in_size, n_class) ----------------
    B, in_size, n_class = 2, 32, 4
    bound = 1.0 / jnp.sqrt(jnp.float32(in_size))
    x = jax.random.normal(kx, (B, in_size), dtype=jnp.float32)
    weight = jax.random.uniform(kw, (n_class, in_size), minval=-bound,
                                maxval=bound, dtype=jnp.float32)
    bias = jax.random.uniform(kb, (n_class,), minval=-bound, maxval=bound,
                              dtype=jnp.float32)

    out = jax.block_until_ready(cls_forward(x, weight, bias))
    ref = ref_softmax(x, weight, bias)
    assert out.shape == (B, n_class)
    assert jnp.allclose(out, ref, atol=5e-3, rtol=5e-3), "single-tile mismatch"
    assert jnp.allclose(jnp.sum(out, axis=1), 1.0, atol=1e-3), "rows must sum to 1"

    # ---- Tiled path: B > 256 forces >= 2 grid steps (v7x 2-TC sharding) ----
    B2 = 512
    x2 = jax.random.normal(kx2, (B2, in_size), dtype=jnp.float32)
    out2 = jax.block_until_ready(cls_forward(x2, weight, bias))
    ref2 = ref_softmax(x2, weight, bias)
    assert out2.shape == (B2, n_class)
    assert jnp.allclose(out2, ref2, atol=5e-3, rtol=5e-3), "tiled mismatch"
    assert jnp.allclose(jnp.sum(out2, axis=1), 1.0, atol=1e-3)

    # ---- Wide-class path (n_class >= 128 -> untransposed, lane-dense) ------
    B3, in3, nc3 = 64, 64, 256
    bound3 = 1.0 / jnp.sqrt(jnp.float32(in3))
    x3 = jax.random.normal(kx3, (B3, in3), dtype=jnp.float32)
    w3 = jax.random.uniform(kw3, (nc3, in3), minval=-bound3, maxval=bound3,
                            dtype=jnp.float32)
    b3 = jax.random.uniform(kb3, (nc3,), minval=-bound3, maxval=bound3,
                            dtype=jnp.float32)
    out3 = jax.block_until_ready(cls_forward(x3, w3, b3))
    ref3 = ref_softmax(x3, w3, b3)
    assert out3.shape == (B3, nc3)
    assert jnp.allclose(out3, ref3, atol=5e-3, rtol=5e-3), "wide-class mismatch"
    assert jnp.allclose(jnp.sum(out3, axis=1), 1.0, atol=1e-3)

    print("KERNEL_OK")
</pallas_src>

<mosaic_0001>
module attributes {stable_mosaic.version = 11 : i64} {
  func.func @_cls_kernel_transposed(%arg0: i32, %arg1: memref<2x32xbf16, #tpu.memory_space<vmem>>, %arg2: memref<4x32xbf16, #tpu.memory_space<vmem>>, %arg3: memref<4x1xf32, #tpu.memory_space<vmem>>, %arg4: memref<4x2xf32, #tpu.memory_space<vmem>>) attributes {dimension_semantics = [#tpu.dimension_semantics<parallel>], iteration_bounds = array<i64: 1>, scalar_prefetch = 0 : i64, scratch_operands = 0 : i64, tpu.core_type = #tpu.core_type<tc>, window_params = [{transform_indices = @transform_0, window_bounds = array<i64: 2, 32>}, {pipeline_mode = #tpu.pipeline_mode<synchronous>, transform_indices = @transform_1, window_bounds = array<i64: 4, 32>}, {pipeline_mode = #tpu.pipeline_mode<synchronous>, transform_indices = @transform_2, window_bounds = array<i64: 4, 1>}, {transform_indices = @transform_3, window_bounds = array<i64: 4, 2>}]} {
    %c0 = arith.constant 0 : index
    %c0_0 = arith.constant 0 : index
    %0 = vector.load %arg2[%c0, %c0_0] : memref<4x32xbf16, #tpu.memory_space<vmem>>, vector<4x32xbf16>
    %c0_1 = arith.constant 0 : index
    %c0_2 = arith.constant 0 : index
    %1 = vector.load %arg1[%c0_1, %c0_2] : memref<2x32xbf16, #tpu.memory_space<vmem>>, vector<2x32xbf16>
    %cst = arith.constant dense<0.000000e+00> : vector<4x2xf32>
    %2 = tpu.matmul %0, %1, %cst {dimension_numbers = #tpu.dot_dimension_numbers<[1], [1], [0], [0], [0, 0, 1, 0], [], []>} : vector<4x32xbf16>, vector<2x32xbf16>, vector<4x2xf32> -> vector<4x2xf32>
    %c0_3 = arith.constant 0 : index
    %c0_4 = arith.constant 0 : index
    %3 = vector.load %arg3[%c0_3, %c0_4] : memref<4x1xf32, #tpu.memory_space<vmem>>, vector<4x1xf32>
    %4 = vector.broadcast %3 : vector<4x1xf32> to vector<4x2xf32>
    %5 = arith.addf %2, %4 : vector<4x2xf32>
    %cst_5 = arith.constant dense<0xFF800000> : vector<2xf32>
    %6 = vector.multi_reduction <maximumf>, %5, %cst_5 [0] : vector<4x2xf32> to vector<2xf32>
    %7 = vector.shape_cast %6 : vector<2xf32> to vector<1x2xf32>
    %8 = vector.broadcast %7 : vector<1x2xf32> to vector<4x2xf32>
    %9 = arith.subf %5, %8 : vector<4x2xf32>
    %10 = math.exp %9 : vector<4x2xf32>
    %cst_6 = arith.constant dense<0.000000e+00> : vector<2xf32>
    %11 = vector.multi_reduction <add>, %10, %cst_6 [0] : vector<4x2xf32> to vector<2xf32>
    %12 = vector.shape_cast %11 : vector<2xf32> to vector<1x2xf32>
    %13 = vector.broadcast %12 : vector<1x2xf32> to vector<4x2xf32>
    %14 = arith.divf %10, %13 : vector<4x2xf32>
    %c0_7 = arith.constant 0 : index
    %c0_8 = arith.constant 0 : index
    %15 = vector.load %arg4[%c0_7, %c0_8] : memref<4x2xf32, #tpu.memory_space<vmem>>, vector<4x2xf32>
    tpu.vector_store %arg4[%c0_7, %c0_8], %14 {strides = array<i32>} : memref<4x2xf32, #tpu.memory_space<vmem>>, vector<4x2xf32>,
    return
  }
  func.func @transform_0(%arg0: i32) -> (i32, i32) {
    %c0_i32 = arith.constant 0 : i32
    %c0_i32_0 = arith.constant 0 : i32
    return %arg0, %c0_i32 : i32, i32
  }
  func.func @transform_1(%arg0: i32) -> (i32, i32) {
    %c0_i32 = arith.constant 0 : i32
    %c0_i32_0 = arith.constant 0 : i32
    %c0_i32_1 = arith.constant 0 : i32
    return %c0_i32, %c0_i32_0 : i32, i32
  }
  func.func @transform_2(%arg0: i32) -> (i32, i32) {
    %c0_i32 = arith.constant 0 : i32
    %c0_i32_0 = arith.constant 0 : i32
    %c0_i32_1 = arith.constant 0 : i32
    return %c0_i32, %c0_i32_0 : i32, i32
  }
  func.func @transform_3(%arg0: i32) -> (i32, i32) {
    %c0_i32 = arith.constant 0 : i32
    %c0_i32_0 = arith.constant 0 : i32
    return %c0_i32, %arg0 : i32, i32
  }
}

module attributes {stable_mosaic.version = 11 : i64} {
  func.func @_cls_kernel_transposed(%arg0: i32, %arg1: memref<2x32xbf16, #tpu.memory_space<vmem>>, %arg2: memref<4x32xbf16, #tpu.memory_space<vmem>>, %arg3: memref<4x1xf32, #tpu.memory_space<vmem>>, %arg4: memref<4x2xf32, #tpu.memory_space<vmem>>) attributes {dimension_semantics = [#tpu.dimension_semantics<parallel>], iteration_bounds = array<i64: 1>, scalar_prefetch = 0 : i64, scratch_operands = 0 : i64, tpu.core_type = #tpu.core_type<tc>, window_params = [{transform_indices = @transform_0, window_bounds = array<i64: 2, 32>}, {pipeline_mode = #tpu.pipeline_mode<synchronous>, transform_indices = @transform_1, window_bounds = array<i64: 4, 32>}, {pipeline_mode = #tpu.pipeline_mode<synchronous>, transform_indices = @transform_2, window_bounds = array<i64: 4, 1>}, {transform_indices = @transform_3, window_bounds = array<i64: 4, 2>}]} {
    %c0 = arith.constant 0 : index
    %c0_0 = arith.constant 0 : index
    %0 = vector.load %arg2[%c0, %c0_0] : memref<4x32xbf16, #tpu.memory_space<vmem>>, vector<4x32xbf16>
    %c0_1 = arith.constant 0 : index
    %c0_2 = arith.constant 0 : index
    %1 = vector.load %arg1[%c0_1, %c0_2] : memref<2x32xbf16, #tpu.memory_space<vmem>>, vector<2x32xbf16>
    %cst = arith.constant dense<0.000000e+00> : vector<4x2xf32>
    %2 = tpu.matmul %0, %1, %cst {dimension_numbers = #tpu.dot_dimension_numbers<[1], [1], [0], [0], [0, 0, 1, 0], [], []>} : vector<4x32xbf16>, vector<2x32xbf16>, vector<4x2xf32> -> vector<4x2xf32>
    %c0_3 = arith.constant 0 : index
    %c0_4 = arith.constant 0 : index
    %3 = vector.load %arg3[%c0_3, %c0_4] : memref<4x1xf32, #tpu.memory_space<vmem>>, vector<4x1xf32>
    %4 = vector.broadcast %3 : vector<4x1xf32> to vector<4x2xf32>
    %5 = arith.addf %2, %4 : vector<4x2xf32>
    %cst_5 = arith.constant dense<0xFF800000> : vector<2xf32>
    %6 = vector.multi_reduction <maximumf>, %5, %cst_5 [0] : vector<4x2xf32> to vector<2xf32>
    %7 = vector.shape_cast %6 : vector<2xf32> to vector<1x2xf32>
    %8 = vector.broadcast %7 : vector<1x2xf32> to vector<4x2xf32>
    %9 = arith.subf %5, %8 : vector<4x2xf32>
    %10 = math.exp %9 : vector<4x2xf32>
    %cst_6 = arith.constant dense<0.000000e+00> : vector<2xf32>
    %11 = vector.multi_reduction <add>, %10, %cst_6 [0] : vector<4x2xf32> to vector<2xf32>
    %12 = vector.shape_cast %11 : vector<2xf32> to vector<1x2xf32>
    %13 = vector.broadcast %12 : vector<1x2xf32> to vector<4x2xf32>
    %14 = arith.divf %10, %13 : vector<4x2xf32>
    %c0_7 = arith.constant 0 : index
    %c0_8 = arith.constant 0 : index
    %15 = vector.load %arg4[%c0_7, %c0_8] : memref<4x2xf32, #tpu.memory_space<vmem>>, vector<4x2xf32>
    tpu.vector_store %arg4[%c0_7, %c0_8], %14 {strides = array<i32>} : memref<4x2xf32, #tpu.memory_space<vmem>>, vector<4x2xf32>,
    return
  }
  func.func @transform_0(%arg0: i32) -> (i32, i32) {
    %c0_i32 = arith.constant 0 : i32
    %c0_i32_0 = arith.constant 0 : i32
    return %arg0, %c0_i32 : i32, i32
  }
  func.func @transform_1(%arg0: i32) -> (i32, i32) {
    %c0_i32 = arith.constant 0 : i32
    %c0_i32_0 = arith.constant 0 : i32
    %c0_i32_1 = arith.constant 0 : i32
    return %c0_i32, %c0_i32_0 : i32, i32
  }
  func.func @transform_2(%arg0: i32) -> (i32, i32) {
    %c0_i32 = arith.constant 0 : i32
    %c0_i32_0 = arith.constant 0 : i32
    %c0_i32_1 = arith.constant 0 : i32
    return %c0_i32, %c0_i32_0 : i32, i32
  }
  func.func @transform_3(%arg0: i32) -> (i32, i32) {
    %c0_i32 = arith.constant 0 : i32
    %c0_i32_0 = arith.constant 0 : i32
    return %c0_i32, %arg0 : i32, i32
  }
}

</mosaic_0001>

<bundles_post_ra>
// kernel: tpu_custom_call.1
= control target key start
LH: loop header
LB: loop body
LE: loop exit
PB: predicated region body
PF: predicated region fallthrough
CT: control target
= control target key end

     0   :  { %vm23_vm0 = vcmask 261120   ;;  %v112_v0 = vmov 0.0   ;;  %vm113_vm1 = vmmov 0   ;;  %v114_v4 = vmov 0   ;;  %s150_s0 = inlined_call_operand.vmem [shape: bf16[2,32], index: 0, kind: input, shape index: {}]   ;;  %s151_s2 = inlined_call_operand.vmem [shape: f32[4,1], index: 2, kind: input, shape index: {}]   ;;  %s152_s1 = inlined_call_operand.vmem [shape: bf16[4,32], index: 1, kind: input, shape index: {}]   ;;  %s153_s3 = inlined_call_operand.vmem [shape: f32[4,2], index: 3, kind: output, shape index: {}]  }
   0x1   :  { %98 = vmatprep.subr.bf16.mxu0 %v112_v0  ;;  %v16_v1 = vld [vmem:[%s150_s0] sm:$0x1]  ;;  %100 = vmatprep.mubr.msk.bf16.mxu0 %vm113_vm1, %v112_v0  ;;  %vm70_vm2 = vcmask 11264  }
   0x2   :  { %v17_v2 = vld [vmem:[%s151_s2] sm:$0xf]  ;;  %v28_v3 = vsel %vm23_vm0, %v16_v1, 0  ;;  %107 = vset.pattern.permute.xlu0 %v114_v4 }
   0x3   :  { %99 = vmatpush3.bf16.xpose.msra.mxu0 %v28_v3  ;;  %20 = vperm.xlu0 %107, %v17_v2   ;;  %v15_v5 = vld [vmem:[%s152_s1] sm:$0x3] }
   0xa   :  { %101 = vmatmul.mubr.msk.bf16.vlgmr.msra.gmra.mxu0 %vm23_vm0, %v15_v5 }
  0x7e   :  { %v21_v6 = vpop.permute.xlu0 %20 }
  0xca   :  { %v64_v7 = vpop.f32.mrf.mxu0 }
  0xcb   :  { %v65_v8 = vadd.f32 %v64_v7, %v21_v6 }
  0xcc   :  { %v102_v9 = vpop.f32.mrf.mxu0 }
  0xcd   :  { %v71_v10 = vsel %vm70_vm2, %v65_v8, -inf }
  0xce   :  { %v72_v11 = vrot.slane %v71_v10, 4  ;;  %v67_v12 = vpop.f32.mrf.mxu0 }
  0xd0   :  { %v73_v13 = vmax.f32 %v71_v10, %v72_v11  ;;  %v103_v14 = vpop.f32.mrf.mxu0 }
  0xd2   :  { %v74_v15 = vrot.slane %v73_v13, 2 }
  0xd4   :  { %v75_v16 = vmax.f32 %v73_v13, %v74_v15 }
  0xd6   :  { %v76_v17 = vrot.slane %v75_v16, 1 }
  0xd8   :  { %v77_v18 = vmax.f32 %v75_v16, %v76_v17 }
  0xda   :  { %v78_v19 = vsub.f32 %v65_v8, %v77_v18 }
  0xdc   :  { %v79_v20 = vmul.f32 1.442695, %v78_v19 }
  0xde   :  { %108 = vpow2.f32 %v79_v20 }
  0xeb   :  { %v109_v21 = vpop.eup %108 }
  0xec   :  { %v81_v22 = vsel %vm70_vm2, %v109_v21, 0.0 }
  0xed   :  { %v82_v23 = vrot.slane %v81_v22, 4 }
  0xef   :  { %v83_v24 = vadd.f32 %v82_v23, %v81_v22 }
  0xf1   :  { %v84_v25 = vrot.slane %v83_v24, 2 }
  0xf3   :  { %v85_v26 = vadd.f32 %v84_v25, %v83_v24 }
  0xf5   :  { %v86_v27 = vrot.slane %v85_v26, 1 }
  0xf7   :  { %v87_v28 = vadd.f32 %v86_v27, %v85_v26 }
  0xf9   :  { %110 = vrcp.f32 %v87_v28 }
 0x106   :  { %v111_v29 = vpop.eup %110 }
 0x107   :  { %v89_v30 = vmul.f32 %v111_v29, %v109_v21 }
 0x109   :  { %90 = vst.msk [vmem:[%s153_s3] sm:$0xf] %vm70_vm2, %v89_v30 }

// kernel: tpu_custom_call.1
= control target key start
LH: loop header
LB: loop body
LE: loop exit
PB: predicated region body
PF: predicated region fallthrough
CT: control target
= control target key end

     0   :  { %vm23_vm0 = vcmask 261120   ;;  %v112_v0 = vmov 0.0   ;;  %vm113_vm1 = vmmov 0   ;;  %v114_v4 = vmov 0   ;;  %s150_s0 = inlined_call_operand.vmem [shape: bf16[2,32], index: 0, kind: input, shape index: {}]   ;;  %s151_s2 = inlined_call_operand.vmem [shape: f32[4,1], index: 2, kind: input, shape index: {}]   ;;  %s152_s1 = inlined_call_operand.vmem [shape: bf16[4,32], index: 1, kind: input, shape index: {}]   ;;  %s153_s3 = inlined_call_operand.vmem [shape: f32[4,2], index: 3, kind: output, shape index: {}]  }
   0x1   :  { %98 = vmatprep.subr.bf16.mxu0 %v112_v0  ;;  %v16_v1 = vld [vmem:[%s150_s0] sm:$0x1]  ;;  %100 = vmatprep.mubr.msk.bf16.mxu0 %vm113_vm1, %v112_v0  ;;  %vm70_vm2 = vcmask 11264  }
   0x2   :  { %v17_v2 = vld [vmem:[%s151_s2] sm:$0xf]  ;;  %v28_v3 = vsel %vm23_vm0, %v16_v1, 0  ;;  %107 = vset.pattern.permute.xlu0 %v114_v4 }
   0x3   :  { %99 = vmatpush3.bf16.xpose.msra.mxu0 %v28_v3  ;;  %20 = vperm.xlu0 %107, %v17_v2   ;;  %v15_v5 = vld [vmem:[%s152_s1] sm:$0x3] }
   0xa   :  { %101 = vmatmul.mubr.msk.bf16.vlgmr.msra.gmra.mxu0 %vm23_vm0, %v15_v5 }
  0x7e   :  { %v21_v6 = vpop.permute.xlu0 %20 }
  0xca   :  { %v64_v7 = vpop.f32.mrf.mxu0 }
  0xcb   :  { %v65_v8 = vadd.f32 %v64_v7, %v21_v6 }
  0xcc   :  { %v102_v9 = vpop.f32.mrf.mxu0 }
  0xcd   :  { %v71_v10 = vsel %vm70_vm2, %v65_v8, -inf }
  0xce   :  { %v72_v11 = vrot.slane %v71_v10, 4  ;;  %v67_v12 = vpop.f32.mrf.mxu0 }
  0xd0   :  { %v73_v13 = vmax.f32 %v71_v10, %v72_v11  ;;  %v103_v14 = vpop.f32.mrf.mxu0 }
  0xd2   :  { %v74_v15 = vrot.slane %v73_v13, 2 }
  0xd4   :  { %v75_v16 = vmax.f32 %v73_v13, %v74_v15 }
  0xd6   :  { %v76_v17 = vrot.slane %v75_v16, 1 }
  0xd8   :  { %v77_v18 = vmax.f32 %v75_v16, %v76_v17 }
  0xda   :  { %v78_v19 = vsub.f32 %v65_v8, %v77_v18 }
  0xdc   :  { %v79_v20 = vmul.f32 1.442695, %v78_v19 }
  0xde   :  { %108 = vpow2.f32 %v79_v20 }
  0xeb   :  { %v109_v21 = vpop.eup %108 }
  0xec   :  { %v81_v22 = vsel %vm70_vm2, %v109_v21, 0.0 }
  0xed   :  { %v82_v23 = vrot.slane %v81_v22, 4 }
  0xef   :  { %v83_v24 = vadd.f32 %v82_v23, %v81_v22 }
  0xf1   :  { %v84_v25 = vrot.slane %v83_v24, 2 }
  0xf3   :  { %v85_v26 = vadd.f32 %v84_v25, %v83_v24 }
  0xf5   :  { %v86_v27 = vrot.slane %v85_v26, 1 }
  0xf7   :  { %v87_v28 = vadd.f32 %v86_v27, %v85_v26 }
  0xf9   :  { %110 = vrcp.f32 %v87_v28 }
 0x106   :  { %v111_v29 = vpop.eup %110 }
 0x107   :  { %v89_v30 = vmul.f32 %v111_v29, %v109_v21 }
 0x109   :  { %90 = vst.msk [vmem:[%s153_s3] sm:$0xf] %vm70_vm2, %v89_v30 }

</bundles_post_ra>
